<compile_context>
chip_gen: v7x
topology: tpu7x:2x2x1
jax: 0.10.0
libtpu: 0.0.40
codegen_flags: <defaults>
</compile_context>

<pallas_src>
import math
import numpy as np
import jax
import jax.numpy as jnp
from jax.experimental import pallas as pl
from jax.experimental.pallas import tpu as pltpu


# ----------------------------- parameter setup (glue) -----------------------

def _bilinear_kernel_1d(k):
    # Same formula as BilinearUp.init_weights (separable factor).
    f = float(math.ceil(k / 2.0))
    c = float(k - 1) / (2.0 * f)
    return np.array([1.0 - abs(i / f - c) for i in range(k)], dtype=np.float32)


def _transposed_conv1d_matrix(n_in, kernel1d, stride, pad):
    # Dense (n_in, n_out) matrix implementing a 1D transposed conv:
    # out[o] = sum_i x[i] * k[o - i*stride + pad]
    k = len(kernel1d)
    n_out = (n_in - 1) * stride - 2 * pad + k
    U = np.zeros((n_in, n_out), dtype=np.float32)
    for i in range(n_in):
        for t in range(k):
            o = i * stride - pad + t
            if 0 <= o < n_out:
                U[i, o] += kernel1d[t]
    return U


_MAX_BATCH_TILE = 256  # bounds the stage-2 batched-matmul unroll per grid step


def _vmem_tile_budget_bytes():
    # Budget for the double-buffered in+out tiles; generation-aware but
    # conservative (works for 64 MiB v7x and 128 MiB v5e/v6e alike).
    cap = 64 << 20
    try:
        cap = int(getattr(pltpu.get_tpu_info(), "vmem_capacity_bytes", cap))
    except Exception:
        pass
    return max(4 << 20, min(16 << 20, cap // 4))


def _choose_batch_tile(B, bytes_per_row, row_align):
    budget = _vmem_tile_budget_bytes()
    cap = max(row_align, (budget // max(bytes_per_row, 1)) // row_align * row_align)
    cap = min(cap, _MAX_BATCH_TILE)
    if B <= cap:
        return B                     # one block covering the whole batch
    bt = (cap // row_align) * row_align
    while bt >= row_align:           # prefer an exact divisor: no ragged block
        if B % bt == 0:
            return bt
        bt -= row_align
    return cap                       # ragged last block; Pallas clips OOB rows


# ------------------------------- Pallas kernel ------------------------------

def _bilinear_up_kernel(x_ref, uw_ref, uht_ref, o_ref):
    bt, h, w = x_ref.shape
    ho = uht_ref.shape[0]
    wo = uw_ref.shape[-1]

    x = x_ref[...]
    # Stage 1: contract W as one flat MXU matmul (M = bt*h), f32 accumulation.
    t = jnp.dot(x.reshape(bt * h, w), uw_ref[...],
                preferred_element_type=jnp.float32)
    t = t.astype(x.dtype).reshape(bt, h, wo)

    # Stage 2: contract H as a batched matmul (batch = bt), keeping Wo on lanes.
    uht_b = jnp.broadcast_to(uht_ref[...], (bt, ho, h))
    out = jnp.einsum("boh,bhw->bow", uht_b, t,
                     preferred_element_type=jnp.float32)
    o_ref[...] = out.astype(o_ref.dtype)


def bilinear_up(x, factor=(1, 2, 2), compute_dtype=None):
    """Pallas implementation of BilinearUp.forward (in_channels == out_channels)."""
    assert factor[0] == 1, "depth upsampling factor must be 1 (module default)"
    assert factor[1] == factor[2], "module requires a square H/W kernel"
    N, C, D, H, W = x.shape
    ksz = [2 * f - f % 2 for f in factor]                  # [1, 4, 4]
    pad = [int(math.ceil((f - 1) / 2.0)) for f in factor]  # [0, 1, 1]

    k1d = _bilinear_kernel_1d(ksz[-1])                     # [0.25, 0.75, 0.75, 0.25]
    Uh = _transposed_conv1d_matrix(H, k1d, factor[1], pad[1])   # (H, Ho)
    Uw = _transposed_conv1d_matrix(W, k1d, factor[2], pad[2])   # (W, Wo)
    Ho, Wo = Uh.shape[1], Uw.shape[1]

    op_dtype = jnp.dtype(compute_dtype) if compute_dtype is not None else x.dtype
    uw = jnp.asarray(Uw, dtype=op_dtype)                   # (W, Wo)   ~2 KiB
    uht = jnp.asarray(np.ascontiguousarray(Uh.T), dtype=op_dtype)  # (Ho, H)

    B = N * C * D
    x3 = x.reshape(B, H, W)
    if op_dtype != x.dtype:
        x3 = x3.astype(op_dtype)     # optional bf16 compute path (halves x DMA)

    in_isz = jnp.dtype(op_dtype).itemsize
    out_isz = jnp.dtype(x.dtype).itemsize
    row_align = 16 if in_isz < 4 else 8
    bytes_per_row = 2 * (H * W * in_isz + Ho * Wo * out_isz)   # double-buffered
    Bt = _choose_batch_tile(B, bytes_per_row, row_align)
    grid_b = pl.cdiv(B, Bt)

    flops = 2 * B * H * Wo * (W + Ho)
    bytes_accessed = (B * H * W * in_isz + B * Ho * Wo * out_isz
                      + (W * Wo + Ho * H) * in_isz)

    out = pl.pallas_call(
        _bilinear_up_kernel,
        out_shape=jax.ShapeDtypeStruct((B, Ho, Wo), x.dtype),
        grid_spec=pltpu.PrefetchScalarGridSpec(
            num_scalar_prefetch=0,
            grid=(grid_b,),
            in_specs=[
                pl.BlockSpec((Bt, H, W), lambda i: (i, 0, 0)),
                pl.BlockSpec((W, Wo), lambda i: (0, 0)),   # tiny resident operator
                pl.BlockSpec((Ho, H), lambda i: (0, 0)),   # tiny resident operator
            ],
            out_specs=pl.BlockSpec((Bt, Ho, Wo), lambda i: (i, 0, 0)),
        ),
        compiler_params=pltpu.CompilerParams(
            dimension_semantics=("parallel",),
            vmem_limit_bytes=32 << 20,
        ),
        cost_estimate=pl.CostEstimate(
            flops=flops, transcendentals=0, bytes_accessed=bytes_accessed),
    )(x3, uw, uht)

    return out.reshape(N, C, D, Ho, Wo)


# ------------------------------ numpy reference -----------------------------

def _ref_bilinear_up(x, factor=(1, 2, 2)):
    """Direct numpy conv_transpose3d with the module's bilinear weight."""
    x = np.asarray(x, dtype=np.float64)
    N, C, D, H, W = x.shape
    ksz = [2 * f - f % 2 for f in factor]
    pad = [int(math.ceil((f - 1) / 2.0)) for f in factor]
    kD, kH, kW = ksz
    sD, sH, sW = factor
    pD, pH, pW = pad

    # Weight exactly as BilinearUp.init_weights builds it.
    f = float(math.ceil(kW / 2.0))
    c = float(kW - 1) / (2.0 * f)
    w2d = np.zeros((kH, kW))
    for w_ in range(kW):
        for h_ in range(kH):
            w2d[h_, w_] = (1 - abs(w_ / f - c)) * (1 - abs(h_ / f - c))
    weight = np.broadcast_to(w2d, (C, 1, kD, kH, kW)).astype(np.float64)

    oD = (D - 1) * sD - 2 * pD + kD
    oH = (H - 1) * sH - 2 * pH + kH
    oW = (W - 1) * sW - 2 * pW + kW
    full = np.zeros((N, C, (D - 1) * sD + kD,
                     (H - 1) * sH + kH, (W - 1) * sW + kW))
    for kd in range(kD):
        for kh in range(kH):
            for kw in range(kW):
                full[:, :, kd:kd + sD * (D - 1) + 1:sD,
                          kh:kh + sH * (H - 1) + 1:sH,
                          kw:kw + sW * (W - 1) + 1:sW] += (
                    x * weight[None, :, 0, kd, kh, kw][..., None, None, None])
    return full[:, :, pD:pD + oD, pH:pH + oH, pW:pW + oW]


# ------------------------------------ main -----------------------------------

if __name__ == "__main__":
    key = jax.random.PRNGKey(0)
    N, C, D, H, W = 2, 4, 3, 16, 16
    x = jax.random.normal(key, (N, C, D, H, W), dtype=jnp.float32)

    y = bilinear_up(x)
    y = jax.block_until_ready(y)

    ref = _ref_bilinear_up(np.asarray(x))
    assert y.shape == ref.shape == (N, C, D, 2 * H, 2 * W), (y.shape, ref.shape)
    np.testing.assert_allclose(np.asarray(y), ref, rtol=1e-5, atol=1e-5)

    print("KERNEL_OK")
</pallas_src>

<mosaic_0001>
module attributes {stable_mosaic.version = 11 : i64} {
  func.func @_bilinear_up_kernel(%arg0: i32, %arg1: memref<24x16x16xf32, #tpu.memory_space<vmem>>, %arg2: memref<16x32xf32, #tpu.memory_space<vmem>>, %arg3: memref<32x16xf32, #tpu.memory_space<vmem>>, %arg4: memref<24x32x32xf32, #tpu.memory_space<vmem>>) attributes {dimension_semantics = [#tpu.dimension_semantics<parallel>], iteration_bounds = array<i64: 1>, scalar_prefetch = 0 : i64, scratch_operands = 0 : i64, tpu.core_type = #tpu.core_type<tc>, window_params = [{transform_indices = @transform_0, window_bounds = array<i64: 24, 16, 16>}, {pipeline_mode = #tpu.pipeline_mode<synchronous>, transform_indices = @transform_1, window_bounds = array<i64: 16, 32>}, {pipeline_mode = #tpu.pipeline_mode<synchronous>, transform_indices = @transform_2, window_bounds = array<i64: 32, 16>}, {transform_indices = @transform_3, window_bounds = array<i64: 24, 32, 32>}]} {
    %c0 = arith.constant 0 : index
    %c0_0 = arith.constant 0 : index
    %c0_1 = arith.constant 0 : index
    %0 = vector.load %arg1[%c0, %c0_0, %c0_1] : memref<24x16x16xf32, #tpu.memory_space<vmem>>, vector<24x16x16xf32>
    %1 = vector.shape_cast %0 : vector<24x16x16xf32> to vector<384x16xf32>
    %c0_2 = arith.constant 0 : index
    %c0_3 = arith.constant 0 : index
    %2 = vector.load %arg2[%c0_2, %c0_3] : memref<16x32xf32, #tpu.memory_space<vmem>>, vector<16x32xf32>
    %cst = arith.constant dense<0.000000e+00> : vector<384x32xf32>
    %3 = tpu.matmul %1, %2, %cst {dimension_numbers = #tpu.dot_dimension_numbers<[1], [0], [0], [1], [0, 0, 1, 1], [], []>} : vector<384x16xf32>, vector<16x32xf32>, vector<384x32xf32> -> vector<384x32xf32>
    %4 = vector.shape_cast %3 : vector<384x32xf32> to vector<24x16x32xf32>
    %c0_4 = arith.constant 0 : index
    %c0_5 = arith.constant 0 : index
    %5 = vector.load %arg3[%c0_4, %c0_5] : memref<32x16xf32, #tpu.memory_space<vmem>>, vector<32x16xf32>
    %6 = vector.shape_cast %5 : vector<32x16xf32> to vector<1x32x16xf32>
    %7 = vector.broadcast %6 : vector<1x32x16xf32> to vector<24x32x16xf32>
    "tpu.trace_start"() <{level = 10 : i32, message = "boh,bhw->bow"}> : () -> ()
    %cst_6 = arith.constant dense<0.000000e+00> : vector<24x32x32xf32>
    %8 = tpu.matmul %7, %4, %cst_6 {dimension_numbers = #tpu.dot_dimension_numbers<[2], [1], [1], [2], [0, 0, 0, 1, 1, 2], [0], [0]>} : vector<24x32x16xf32>, vector<24x16x32xf32>, vector<24x32x32xf32> -> vector<24x32x32xf32>
    "tpu.trace_stop"() : () -> ()
    %c0_7 = arith.constant 0 : index
    %c0_8 = arith.constant 0 : index
    %c0_9 = arith.constant 0 : index
    %9 = vector.load %arg4[%c0_7, %c0_8, %c0_9] : memref<24x32x32xf32, #tpu.memory_space<vmem>>, vector<24x32x32xf32>
    tpu.vector_store %arg4[%c0_7, %c0_8, %c0_9], %8 {strides = array<i32>} : memref<24x32x32xf32, #tpu.memory_space<vmem>>, vector<24x32x32xf32>,
    return
  }
  func.func @transform_0(%arg0: i32) -> (i32, i32, i32) {
    %c0_i32 = arith.constant 0 : i32
    %c0_i32_0 = arith.constant 0 : i32
    %c0_i32_1 = arith.constant 0 : i32
    return %arg0, %c0_i32, %c0_i32_0 : i32, i32, i32
  }
  func.func @transform_1(%arg0: i32) -> (i32, i32) {
    %c0_i32 = arith.constant 0 : i32
    %c0_i32_0 = arith.constant 0 : i32
    %c0_i32_1 = arith.constant 0 : i32
    return %c0_i32, %c0_i32_0 : i32, i32
  }
  func.func @transform_2(%arg0: i32) -> (i32, i32) {
    %c0_i32 = arith.constant 0 : i32
    %c0_i32_0 = arith.constant 0 : i32
    %c0_i32_1 = arith.constant 0 : i32
    return %c0_i32, %c0_i32_0 : i32, i32
  }
  func.func @transform_3(%arg0: i32) -> (i32, i32, i32) {
    %c0_i32 = arith.constant 0 : i32
    %c0_i32_0 = arith.constant 0 : i32
    %c0_i32_1 = arith.constant 0 : i32
    return %arg0, %c0_i32, %c0_i32_0 : i32, i32, i32
  }
}

</mosaic_0001>

<bundles_post_ra>
// kernel: tpu_custom_call.1
= control target key start
LH: loop header
LB: loop body
LE: loop exit
PB: predicated region body
PF: predicated region fallthrough
CT: control target
= control target key end

     0   :  { %vm65_vm0 = vcmask 130048   ;;  %s4030_s0 = inlined_call_operand.vmem [shape: f32[24,16,16], index: 0, kind: input, shape index: {}]   ;;  %s4031_s1 = inlined_call_operand.vmem [shape: f32[16,32], index: 1, kind: input, shape index: {}]   ;;  %s4032_s2 = inlined_call_operand.vmem [shape: f32[32,16], index: 2, kind: input, shape index: {}]   ;;  %s4033_s3 = inlined_call_operand.hbm [shape: f32[24,32,32], index: 3, kind: output, shape index: {}]  }
   0x1   :  { %v63_v0 = vld [vmem:[%s4031_s1] sm:$0xff]  ;;  %v64_v1 = vld [vmem:[%s4031_s1 + $0x8] sm:$0xff]  ;;  %v17_v5 = vld [vmem:[%s4030_s0 + $0x10] sm:$0xff] }
   0x2   :  { %v15_v2 = vld [vmem:[%s4030_s0] sm:$0xff]  ;;  %v3338_v3 = vpack.c.bf16 %v64_v1, %v63_v0  ;;  %v16_v4 = vld [vmem:[%s4030_s0 + $0x8] sm:$0xff]  ;;  %v18_v6 = vld [vmem:[%s4030_s0 + $0x18] sm:$0xff] }
   0x3   :  { %3026 = vmatprep.mubr.msk.f32.mxu0 %vm65_vm0, %v15_v2  ;;  %v19_v7 = vld [vmem:[%s4030_s0 + $0x20] sm:$0xff]  ;;  %v20_v8 = vld [vmem:[%s4030_s0 + $0x28] sm:$0xff]  ;;  %v21_v9 = vld [vmem:[%s4030_s0 + $0x30] sm:$0xff] }
   0x4   :  { %3339 = vmatprep.subr.bf16.mxu0 %v3338_v3  ;;  %v22_v10 = vld [vmem:[%s4030_s0 + $0x38] sm:$0xff] }
   0x5   :  { %3341 = vmatpush3.bf16.msra.mxu0 %v3338_v3 }
   0x8   :  { %3027 = vmatmul.mubr.msk.f32.vlgmr.msra.gmra.mrb[0].mxu0 %vm65_vm0, %v16_v4 }
   0x9   :  { %3029 = vmatprep.mubr.msk.f32.mxu0 %vm65_vm0, %v17_v5 }
   0xc   :  { %3030 = vmatmul.mubr.msk.f32.gmra.mrb[2].mxu0 %vm65_vm0, %v18_v6 }
   0xd   :  { %3032 = vmatprep.mubr.msk.f32.mxu0 %vm65_vm0, %v19_v7 }
  0x10   :  { %3033 = vmatmul.mubr.msk.f32.gmra.mrb[4].mxu0 %vm65_vm0, %v20_v8 }
  0x11   :  { %3035 = vmatprep.mubr.msk.f32.mxu0 %vm65_vm0, %v21_v9 }
  0x12   :  { %8 = vsyncpa [#allocation3], 0  ;;  %v23_v11 = vld [vmem:[%s4030_s0 + $0x40] sm:$0xff]  ;;  %v24_v12 = vld [vmem:[%s4030_s0 + $0x48] sm:$0xff]  ;;  %vm2571_vm1 = vcmask 261120  }
  0x13   :  { %v25_v13 = vld [vmem:[%s4030_s0 + $0x50] sm:$0xff]  ;;  %v26_v14 = vld [vmem:[%s4030_s0 + $0x58] sm:$0xff]  ;;  %v27_v15 = vld [vmem:[%s4030_s0 + $0x60] sm:$0xff] }
  0x14   :  { %3036 = vmatmul.mubr.msk.f32.gmra.mrb[6].mxu0 %vm65_vm0, %v22_v10  ;;  %v28_v16 = vld [vmem:[%s4030_s0 + $0x68] sm:$0xff]  ;;  %v29_v17 = vld [vmem:[%s4030_s0 + $0x70] sm:$0xff]  ;;  %v30_v18 = vld [vmem:[%s4030_s0 + $0x78] sm:$0xff] }
  0x15   :  { %3038 = vmatprep.mubr.msk.f32.mxu0 %vm65_vm0, %v23_v11  ;;  %v31_v19 = vld [vmem:[%s4030_s0 + $0x80] sm:$0xff]  ;;  %v32_v20 = vld [vmem:[%s4030_s0 + $0x88] sm:$0xff]  ;;  %v33_v21 = vld [vmem:[%s4030_s0 + $0x90] sm:$0xff] }
  0x16   :  { %v34_v22 = vld [vmem:[%s4030_s0 + $0x98] sm:$0xff]  ;;  %v35_v23 = vld [vmem:[%s4030_s0 + $0xa0] sm:$0xff]  ;;  %v36_v24 = vld [vmem:[%s4030_s0 + $0xa8] sm:$0xff] }
  0x17   :  { %v37_v25 = vld [vmem:[%s4030_s0 + $0xb0] sm:$0xff]  ;;  %v38_v26 = vld [vmem:[%s4030_s0 + $0xb8] sm:$0xff]  ;;  %v39_v27 = vld [vmem:[%s4030_s0 + $0xc0] sm:$0xff] }
  0x18   :  { %3039 = vmatmul.mubr.msk.f32.gmra.mrb[8].mxu0 %vm65_vm0, %v24_v12  ;;  %v40_v28 = vld [vmem:[%s4030_s0 + $0xc8] sm:$0xff]  ;;  %v41_v29 = vld [vmem:[%s4030_s0 + $0xd0] sm:$0xff]  ;;  %v42_v30 = vld [vmem:[%s4030_s0 + $0xd8] sm:$0xff] }
  0x19   :  { %3041 = vmatprep.mubr.msk.f32.mxu0 %vm65_vm0, %v25_v13  ;;  %v43_v31 = vld [vmem:[%s4030_s0 + $0xe0] sm:$0xff]  ;;  %v44_v32 = vld [vmem:[%s4030_s0 + $0xe8] sm:$0xff]  ;;  %v45_v33 = vld [vmem:[%s4030_s0 + $0xf0] sm:$0xff] }
  0x1a   :  { %v46_v34 = vld [vmem:[%s4030_s0 + $0xf8] sm:$0xff]  ;;  %v47_v35 = vld [vmem:[%s4030_s0 + $0x100] sm:$0xff]  ;;  %v48_v36 = vld [vmem:[%s4030_s0 + $0x108] sm:$0xff] }
  0x1b   :  { %v49_v37 = vld [vmem:[%s4030_s0 + $0x110] sm:$0xff]  ;;  %v50_v38 = vld [vmem:[%s4030_s0 + $0x118] sm:$0xff]  ;;  %v51_v39 = vld [vmem:[%s4030_s0 + $0x120] sm:$0xff] }
  0x1c   :  { %3042 = vmatmul.mubr.msk.f32.gmra.mrb[10].mxu0 %vm65_vm0, %v26_v14  ;;  %v52_v40 = vld [vmem:[%s4030_s0 + $0x128] sm:$0xff]  ;;  %v53_v41 = vld [vmem:[%s4030_s0 + $0x130] sm:$0xff]  ;;  %v54_v42 = vld [vmem:[%s4030_s0 + $0x138] sm:$0xff] }
  0x1d   :  { %3044 = vmatprep.mubr.msk.f32.mxu0 %vm65_vm0, %v27_v15  ;;  %v55_v43 = vld [vmem:[%s4030_s0 + $0x140] sm:$0xff]  ;;  %v56_v44 = vld [vmem:[%s4030_s0 + $0x148] sm:$0xff]  ;;  %v57_v45 = vld [vmem:[%s4030_s0 + $0x150] sm:$0xff] }
  0x1e   :  { %v58_v46 = vld [vmem:[%s4030_s0 + $0x158] sm:$0xff]  ;;  %v59_v47 = vld [vmem:[%s4030_s0 + $0x160] sm:$0xff]  ;;  %v60_v48 = vld [vmem:[%s4030_s0 + $0x168] sm:$0xff] }
  0x1f   :  { %v61_v49 = vld [vmem:[%s4030_s0 + $0x170] sm:$0xff]  ;;  %v62_v50 = vld [vmem:[%s4030_s0 + $0x178] sm:$0xff]  ;;  %v3688_v51 = vld [vmem:[%s4032_s2] sm:$0xff] }
  0x20   :  { %3045 = vmatmul.mubr.msk.f32.gmra.mrb[12].mxu0 %vm65_vm0, %v28_v16  ;;  %3102 = vmatprep.mubr.msk.f32.mxu1 %vm65_vm0, %v3688_v51  ;;  %v3698_v57 = vld [vmem:[%s4032_s2 + $0x8] sm:$0xff]  ;;  %v3703_v59 = vld [vmem:[%s4032_s2 + $0x10] sm:$0xff]  ;;  %v3712_v62 = vld [vmem:[%s4032_s2 + $0x18] sm:$0xff]  ;;  %s3465_s2 = smov [#allocation2]  }
  0x21   :  { %3047 = vmatprep.mubr.msk.f32.mxu0 %vm65_vm0, %v29_v17  ;;  %s2673_s7 = sshll.u32 %s3465_s2, 4  ;;  %s2674_s7 = int_to_ptr.vmem [resolvable:$true] %s2673_s7 }
  0x22   :  { %s3441_s8 = scalar_lea.vmem %s2674_s7, 12288  ;;  %p3446_p1 = scmp.lt.s32.totalorder %s2674_s7, %s2674_s7 }
  0x23   :  { %p3442_p0 = scmp.ne.s32.totalorder %s2674_s7, %s3441_s8  ;;  %p3447_p2 = scmp.lt.s32.totalorder %s3441_s8, %s3441_s8 }
  0x24   :  { %3048 = vmatmul.mubr.msk.f32.gmra.mrb[14].mxu0 %vm65_vm0, %v30_v18 }
  0x25   :  { %3050 = vmatprep.mubr.msk.f32.mxu0 %vm65_vm0, %v31_v19  ;;  %p3448_p3 = por %p3447_p2, %p3446_p1 }
  0x27   :  { %p3449_p4 = pnand %p3448_p3, %p3442_p0 }
  0x28   :  { %3051 = vmatmul.mubr.msk.f32.gmra.mrb[16].mxu0 %vm65_vm0, %v32_v20 }
  0x29   :  { %3053 = vmatprep.mubr.msk.f32.mxu0 %vm65_vm0, %v33_v21 }
  0x2c   :  { %3054 = vmatmul.mubr.msk.f32.gmra.mrb[18].mxu0 %vm65_vm0, %v34_v22 }
  0x2d   :  { %3056 = vmatprep.mubr.msk.f32.mxu0 %vm65_vm0, %v35_v23 }
  0x30   :  { %3057 = vmatmul.mubr.msk.f32.gmra.mrb[20].mxu0 %vm65_vm0, %v36_v24 }
  0x31   :  { %3059 = vmatprep.mubr.msk.f32.mxu0 %vm65_vm0, %v37_v25 }
  0x34   :  { %3060 = vmatmul.mubr.msk.f32.gmra.mrb[22].mxu0 %vm65_vm0, %v38_v26 }
  0x35   :  { %3062 = vmatprep.mubr.msk.f32.mxu0 %vm65_vm0, %v39_v27 }
  0x38   :  { %3063 = vmatmul.mubr.msk.f32.gmra.mrb[24].mxu0 %vm65_vm0, %v40_v28 }
  0x39   :  { %3065 = vmatprep.mubr.msk.f32.mxu0 %vm65_vm0, %v41_v29 }
  0x3c   :  { %3066 = vmatmul.mubr.msk.f32.gmra.mrb[26].mxu0 %vm65_vm0, %v42_v30 }
  0x3d   :  { %3068 = vmatprep.mubr.msk.f32.mxu0 %vm65_vm0, %v43_v31 }
  0x40   :  { %3069 = vmatmul.mubr.msk.f32.gmra.mrb[28].mxu0 %vm65_vm0, %v44_v32 }
  0x41   :  { %3071 = vmatprep.mubr.msk.f32.mxu0 %vm65_vm0, %v45_v33 }
  0x44   :  { %3072 = vmatmul.mubr.msk.f32.gmra.mrb[30].mxu0 %vm65_vm0, %v46_v34 }
  0x45   :  { %3074 = vmatprep.mubr.msk.f32.mxu0 %vm65_vm0, %v47_v35 }
  0x48   :  { %3075 = vmatmul.mubr.msk.f32.gmra.mrb[32].mxu0 %vm65_vm0, %v48_v36 }
  0x49   :  { %3077 = vmatprep.mubr.msk.f32.mxu0 %vm65_vm0, %v49_v37 }
  0x4c   :  { %3078 = vmatmul.mubr.msk.f32.gmra.mrb[34].mxu0 %vm65_vm0, %v50_v38 }
  0x4d   :  { %3080 = vmatprep.mubr.msk.f32.mxu0 %vm65_vm0, %v51_v39 }
  0x50   :  { %3081 = vmatmul.mubr.msk.f32.gmra.mrb[36].mxu0 %vm65_vm0, %v52_v40 }
  0x51   :  { %3083 = vmatprep.mubr.msk.f32.mxu0 %vm65_vm0, %v53_v41 }
  0x54   :  { %3084 = vmatmul.mubr.msk.f32.gmra.mrb[38].mxu0 %vm65_vm0, %v54_v42 }
  0x55   :  { %3086 = vmatprep.mubr.msk.f32.mxu0 %vm65_vm0, %v55_v43 }
  0x58   :  { %3087 = vmatmul.mubr.msk.f32.gmra.mrb[40].mxu0 %vm65_vm0, %v56_v44 }
  0x59   :  { %3089 = vmatprep.mubr.msk.f32.mxu0 %vm65_vm0, %v57_v45 }
  0x5c   :  { %3090 = vmatmul.mubr.msk.f32.gmra.mrb[42].mxu0 %vm65_vm0, %v58_v46 }
  0x5d   :  { %3092 = vmatprep.mubr.msk.f32.mxu0 %vm65_vm0, %v59_v47 }
  0x60   :  { %3093 = vmatmul.mubr.msk.f32.gmra.mrb[44].mxu0 %vm65_vm0, %v60_v48 }
  0x61   :  { %3095 = vmatprep.mubr.msk.f32.mxu0 %vm65_vm0, %v61_v49 }
  0x64   :  { %3096 = vmatmul.mubr.msk.f32.gmra.mrb[46].mxu0 %vm65_vm0, %v62_v50 }
  0x65   :  { %3222 = vmatprep.mubr.msk.f32.mxu0 %vm65_vm0, %v3688_v51 }
  0xdb   :  { %v3028_v52 = vpop.f32.mrb[0].mxu0 }
  0xdc   :  { %v276_v53 = vpop.f32.mrb[1].mxu0 }
  0xdd   :  { %v3342_v54 = vpack.c.bf16 %v3028_v52, %v276_v53 }
  0xdf   :  { %v3031_v55 = vpop.f32.mrb[2].mxu0  ;;  %3343 = vmatprep.subr.bf16.mxu1 %v3342_v54 }
  0xe0   :  { %v286_v56 = vpop.f32.mrb[3].mxu0  ;;  %3345 = vmatpush3.bf16.msra.mxu1 %v3342_v54 }
  0xe1   :  { %v3346_v58 = vpack.c.bf16 %v3031_v55, %v286_v56 }
  0xe3   :  { %v3034_v60 = vpop.f32.mrb[4].mxu0  ;;  %3103 = vmatmul.mubr.msk.f32.vlgmr.msra.gmra.mrb[0].mxu1 %vm65_vm0, %v3698_v57  ;;  %3347 = vmatprep.subr.bf16.mxu1 %v3346_v58 }
  0xe4   :  { %v296_v61 = vpop.f32.mrb[5].mxu0  ;;  %3349 = vmatpush3.bf16.msra.mxu1 %v3346_v58  ;;  %3105 = vmatprep.mubr.msk.f32.mxu1 %vm65_vm0, %v3703_v59 }
  0xe5   :  { %v3350_v63 = vpack.c.bf16 %v3034_v60, %v296_v61 }
  0xe7   :  { %v3037_v0 = vpop.f32.mrb[6].mxu0  ;;  %3106 = vmatmul.mubr.msk.f32.gmra.mrb[2].mxu1 %vm65_vm0, %v3712_v62  ;;  %3351 = vmatprep.subr.bf16.mxu1 %v3350_v63 }
  0xe8   :  { %v306_v1 = vpop.f32.mrb[7].mxu0  ;;  %3112 = vmatprep.mubr.msk.f32.mxu1 %vm65_vm0, %v3688_v51 }
  0xe9   :  { %v3354_v2 = vpack.c.bf16 %v3037_v0, %v306_v1 }
  0xeb   :  { %v3040_v3 = vpop.f32.mrb[8].mxu0  ;;  %3113 = vmatmul.mubr.msk.f32.vlgmr.msra.gmra.mrb[4].mxu1 %vm65_vm0, %v3698_v57 }
  0xec   :  { %3353 = vmatpush3.bf16.msra.mxu1 %v3350_v63  ;;  %v316_v4 = vpop.f32.mrb[9].mxu0  ;;  %3115 = vmatprep.mubr.msk.f32.mxu1 %vm65_vm0, %v3703_v59 }
  0xed   :  { %v3358_v5 = vpack.c.bf16 %v3040_v3, %v316_v4  ;;  %3355 = vmatprep.subr.bf16.mxu1 %v3354_v2 }
  0xef   :  { %v3043_v6 = vpop.f32.mrb[10].mxu0  ;;  %3116 = vmatmul.mubr.msk.f32.gmra.mrb[6].mxu1 %vm65_vm0, %v3712_v62 }
  0xf0   :  { %v326_v7 = vpop.f32.mrb[11].mxu0  ;;  %3122 = vmatprep.mubr.msk.f32.mxu1 %vm65_vm0, %v3688_v51 }
  0xf1   :  { %v3362_v8 = vpack.c.bf16 %v3043_v6, %v326_v7 }
  0xf3   :  { %v3046_v9 = vpop.f32.mrb[12].mxu0  ;;  %3123 = vmatmul.mubr.msk.f32.vlgmr.msra.gmra.mrb[8].mxu1 %vm65_vm0, %v3698_v57 }
  0xf4   :  { %3357 = vmatpush3.bf16.msra.mxu1 %v3354_v2  ;;  %v336_v10 = vpop.f32.mrb[13].mxu0  ;;  %3125 = vmatprep.mubr.msk.f32.mxu1 %vm65_vm0, %v3703_v59 }
  0xf5   :  { %v3366_v11 = vpack.c.bf16 %v3046_v9, %v336_v10  ;;  %3359 = vmatprep.subr.bf16.mxu1 %v3358_v5 }
  0xf7   :  { %v3049_v12 = vpop.f32.mrb[14].mxu0  ;;  %3126 = vmatmul.mubr.msk.f32.gmra.mrb[10].mxu1 %vm65_vm0, %v3712_v62 }
  0xf8   :  { %v346_v13 = vpop.f32.mrb[15].mxu0  ;;  %3132 = vmatprep.mubr.msk.f32.mxu1 %vm65_vm0, %v3688_v51 }
  0xf9   :  { %v3370_v14 = vpack.c.bf16 %v3049_v12, %v346_v13 }
  0xfb   :  { %v3052_v15 = vpop.f32.mrb[16].mxu0  ;;  %3133 = vmatmul.mubr.msk.f32.vlgmr.msra.gmra.mrb[12].mxu1 %vm65_vm0, %v3698_v57 }
  0xfc   :  { %3361 = vmatpush3.bf16.msra.mxu1 %v3358_v5  ;;  %v356_v16 = vpop.f32.mrb[17].mxu0  ;;  %3135 = vmatprep.mubr.msk.f32.mxu1 %vm65_vm0, %v3703_v59 }
  0xfd   :  { %v3374_v17 = vpack.c.bf16 %v3052_v15, %v356_v16  ;;  %3363 = vmatprep.subr.bf16.mxu1 %v3362_v8 }
  0xff   :  { %v3055_v18 = vpop.f32.mrb[18].mxu0  ;;  %3136 = vmatmul.mubr.msk.f32.gmra.mrb[14].mxu1 %vm65_vm0, %v3712_v62 }
 0x100   :  { %v366_v19 = vpop.f32.mrb[19].mxu0  ;;  %3142 = vmatprep.mubr.msk.f32.mxu1 %vm65_vm0, %v3688_v51 }
 0x101   :  { %v3742_v20 = vpack.c.bf16 %v3055_v18, %v366_v19 }
 0x103   :  { %v3058_v21 = vpop.f32.mrb[20].mxu0  ;;  %3143 = vmatmul.mubr.msk.f32.vlgmr.msra.gmra.mrb[16].mxu1 %vm65_vm0, %v3698_v57 }
 0x104   :  { %3365 = vmatpush3.bf16.msra.mxu1 %v3362_v8  ;;  %v376_v22 = vpop.f32.mrb[21].mxu0  ;;  %3145 = vmatprep.mubr.msk.f32.mxu1 %vm65_vm0, %v3703_v59 }
 0x105   :  { %v3748_v23 = vpack.c.bf16 %v3058_v21, %v376_v22  ;;  %3367 = vmatprep.subr.bf16.mxu1 %v3366_v11 }
 0x107   :  { %v3061_v24 = vpop.f32.mrb[22].mxu0  ;;  %3146 = vmatmul.mubr.msk.f32.gmra.mrb[18].mxu1 %vm65_vm0, %v3712_v62 }
 0x108   :  { %v386_v25 = vpop.f32.mrb[23].mxu0  ;;  %3152 = vmatprep.mubr.msk.f32.mxu1 %vm65_vm0, %v3688_v51 }
 0x109   :  { %v3754_v26 = vpack.c.bf16 %v3061_v24, %v386_v25 }
 0x10b   :  { %v3064_v27 = vpop.f32.mrb[24].mxu0  ;;  %3153 = vmatmul.mubr.msk.f32.vlgmr.msra.gmra.mrb[20].mxu1 %vm65_vm0, %v3698_v57 }
 0x10c   :  { %3369 = vmatpush3.bf16.msra.mxu1 %v3366_v11  ;;  %v396_v28 = vpop.f32.mrb[25].mxu0  ;;  %3155 = vmatprep.mubr.msk.f32.mxu1 %vm65_vm0, %v3703_v59 }
 0x10d   :  { %v3390_v29 = vpack.c.bf16 %v3064_v27, %v396_v28  ;;  %3371 = vmatprep.subr.bf16.mxu1 %v3370_v14 }
 0x10f   :  { %3156 = vmatmul.mubr.msk.f32.gmra.mrb[22].mxu1 %vm65_vm0, %v3712_v62  ;;  %3391 = vmatprep.subr.bf16.mxu0 %v3390_v29  ;;  %v3067_v30 = vpop.f32.mrb[26].mxu0 }
 0x110   :  { %3393 = vmatpush3.bf16.msra.mxu0 %v3390_v29  ;;  %3162 = vmatprep.mubr.msk.f32.mxu1 %vm65_vm0, %v3688_v51  ;;  %v406_v31 = vpop.f32.mrb[27].mxu0 }
 0x111   :  { %v3764_v32 = vpack.c.bf16 %v3067_v30, %v406_v31 }
 0x113   :  { %3163 = vmatmul.mubr.msk.f32.vlgmr.msra.gmra.mrb[24].mxu1 %vm65_vm0, %v3698_v57  ;;  %v3070_v33 = vpop.f32.mrb[28].mxu0  ;;  %3223 = vmatmul.mubr.msk.f32.vlgmr.msra.gmra.mrb[48].mxu0 %vm65_vm0, %v3698_v57 }
 0x114   :  { %3373 = vmatpush3.bf16.msra.mxu1 %v3370_v14  ;;  %3165 = vmatprep.mubr.msk.f32.mxu1 %vm65_vm0, %v3703_v59  ;;  %v416_v34 = vpop.f32.mrb[29].mxu0 }
 0x115   :  { %3375 = vmatprep.subr.bf16.mxu1 %v3374_v17  ;;  %v3398_v35 = vpack.c.bf16 %v3070_v33, %v416_v34  ;;  %3225 = vmatprep.mubr.msk.f32.mxu0 %vm65_vm0, %v3703_v59 }
 0x117   :  { %3166 = vmatmul.mubr.msk.f32.gmra.mrb[26].mxu1 %vm65_vm0, %v3712_v62  ;;  %v3073_v36 = vpop.f32.mrb[30].mxu0  ;;  %3399 = vmatprep.subr.bf16.mxu0 %v3398_v35 }
 0x118   :  { %3172 = vmatprep.mubr.msk.f32.mxu1 %vm65_vm0, %v3688_v51  ;;  %v426_v37 = vpop.f32.mrb[31].mxu0  ;;  %3401 = vmatpush3.bf16.msra.mxu0 %v3398_v35 }
 0x119   :  { %v3778_v38 = vpack.c.bf16 %v3073_v36, %v426_v37  ;;  %3226 = vmatmul.mubr.msk.f32.gmra.mrb[50].mxu0 %vm65_vm0, %v3712_v62 }
 0x11a   :  { %3242 = vmatprep.mubr.msk.f32.mxu0 %vm65_vm0, %v3688_v51 }
 0x11b   :  { %3173 = vmatmul.mubr.msk.f32.vlgmr.msra.gmra.mrb[28].mxu1 %vm65_vm0, %v3698_v57  ;;  %v3076_v39 = vpop.f32.mrb[32].mxu0 }
 0x11c   :  { %3377 = vmatpush3.bf16.msra.mxu1 %v3374_v17  ;;  %3175 = vmatprep.mubr.msk.f32.mxu1 %vm65_vm0, %v3703_v59  ;;  %v436_v40 = vpop.f32.mrb[33].mxu0 }
 0x11d   :  { %3379 = vmatprep.subr.bf16.mxu1 %v3742_v20  ;;  %v3406_v41 = vpack.c.bf16 %v3076_v39, %v436_v40  ;;  %3243 = vmatmul.mubr.msk.f32.vlgmr.msra.gmra.mrb[52].mxu0 %vm65_vm0, %v3698_v57 }
 0x11e   :  { %3245 = vmatprep.mubr.msk.f32.mxu0 %vm65_vm0, %v3703_v59 }
 0x11f   :  { %3176 = vmatmul.mubr.msk.f32.gmra.mrb[30].mxu1 %vm65_vm0, %v3712_v62  ;;  %v3079_v42 = vpop.f32.mrb[34].mxu0  ;;  %3407 = vmatprep.subr.bf16.mxu0 %v3406_v41 }
 0x120   :  { %3182 = vmatprep.mubr.msk.f32.mxu1 %vm65_vm0, %v3688_v51  ;;  %v446_v43 = vpop.f32.mrb[35].mxu0  ;;  %3409 = vmatpush3.bf16.msra.mxu0 %v3406_v41 }
 0x121   :  { %v3797_v44 = vpack.c.bf16 %v3079_v42, %v446_v43  ;;  %3246 = vmatmul.mubr.msk.f32.gmra.mrb[54].mxu0 %vm65_vm0, %v3712_v62 }
 0x122   :  { %3262 = vmatprep.mubr.msk.f32.mxu0 %vm65_vm0, %v3688_v51 }
 0x123   :  { %3183 = vmatmul.mubr.msk.f32.vlgmr.msra.gmra.mrb[32].mxu1 %vm65_vm0, %v3698_v57  ;;  %v3082_v45 = vpop.f32.mrb[36].mxu0 }
 0x124   :  { %3381 = vmatpush3.bf16.msra.mxu1 %v3742_v20  ;;  %3185 = vmatprep.mubr.msk.f32.mxu1 %vm65_vm0, %v3703_v59  ;;  %v456_v46 = vpop.f32.mrb[37].mxu0 }
 0x125   :  { %3383 = vmatprep.subr.bf16.mxu1 %v3748_v23  ;;  %v3414_v47 = vpack.c.bf16 %v3082_v45, %v456_v46  ;;  %3263 = vmatmul.mubr.msk.f32.vlgmr.msra.gmra.mrb[56].mxu0 %vm65_vm0, %v3698_v57 }
 0x126   :  { %3265 = vmatprep.mubr.msk.f32.mxu0 %vm65_vm0, %v3703_v59 }
 0x127   :  { %3186 = vmatmul.mubr.msk.f32.gmra.mrb[34].mxu1 %vm65_vm0, %v3712_v62  ;;  %v3085_v48 = vpop.f32.mrb[38].mxu0  ;;  %3415 = vmatprep.subr.bf16.mxu0 %v3414_v47 }
 0x128   :  { %3192 = vmatprep.mubr.msk.f32.mxu1 %vm65_vm0, %v3688_v51  ;;  %v466_v49 = vpop.f32.mrb[39].mxu0  ;;  %3417 = vmatpush3.bf16.msra.mxu0 %v3414_v47 }
 0x129   :  { %v3418_v50 = vpack.c.bf16 %v3085_v48, %v466_v49  ;;  %3266 = vmatmul.mubr.msk.f32.gmra.mrb[58].mxu0 %vm65_vm0, %v3712_v62 }
 0x12a   :  { %3282 = vmatprep.mubr.msk.f32.mxu0 %vm65_vm0, %v3688_v51 }
 0x12b   :  { %3193 = vmatmul.mubr.msk.f32.vlgmr.msra.gmra.mrb[36].mxu1 %vm65_vm0, %v3698_v57  ;;  %v3088_v52 = vpop.f32.mrb[40].mxu0 }
 0x12c   :  { %3385 = vmatpush3.bf16.msra.mxu1 %v3748_v23  ;;  %3195 = vmatprep.mubr.msk.f32.mxu1 %vm65_vm0, %v3703_v59  ;;  %v476_v53 = vpop.f32.mrb[41].mxu0 }
 0x12d   :  { %3387 = vmatprep.subr.bf16.mxu1 %v3754_v26  ;;  %v3422_v54 = vpack.c.bf16 %v3088_v52, %v476_v53  ;;  %3283 = vmatmul.mubr.msk.f32.vlgmr.msra.gmra.mrb[60].mxu0 %vm65_vm0, %v3698_v57 }
 0x12e   :  { %3285 = vmatprep.mubr.msk.f32.mxu0 %vm65_vm0, %v3703_v59 }
 0x12f   :  { %3196 = vmatmul.mubr.msk.f32.gmra.mrb[38].mxu1 %vm65_vm0, %v3712_v62  ;;  %v3091_v55 = vpop.f32.mrb[42].mxu0  ;;  %3423 = vmatprep.subr.bf16.mxu0 %v3422_v54 }
 0x130   :  { %3202 = vmatprep.mubr.msk.f32.mxu1 %vm65_vm0, %v3688_v51  ;;  %v486_v56 = vpop.f32.mrb[43].mxu0  ;;  %3425 = vmatpush3.bf16.msra.mxu0 %v3422_v54 }
 0x131   :  { %v3426_v58 = vpack.c.bf16 %v3091_v55, %v486_v56  ;;  %3286 = vmatmul.mubr.msk.f32.gmra.mrb[62].mxu0 %vm65_vm0, %v3712_v62 }
 0x132   :  { %3302 = vmatprep.mubr.msk.f32.mxu0 %vm65_vm0, %v3688_v51 }
 0x133   :  { %3203 = vmatmul.mubr.msk.f32.vlgmr.msra.gmra.mrb[40].mxu1 %vm65_vm0, %v3698_v57  ;;  %v3094_v60 = vpop.f32.mrb[44].mxu0 }
 0x134   :  { %3389 = vmatpush3.bf16.msra.mxu1 %v3754_v26  ;;  %3205 = vmatprep.mubr.msk.f32.mxu1 %vm65_vm0, %v3703_v59  ;;  %v496_v61 = vpop.f32.mrb[45].mxu0 }
 0x135   :  { %3395 = vmatprep.subr.bf16.mxu1 %v3764_v32  ;;  %v3430_v63 = vpack.c.bf16 %v3094_v60, %v496_v61  ;;  %3303 = vmatmul.mubr.msk.f32.vlgmr.msra.gmra.mrb[64].mxu0 %vm65_vm0, %v3698_v57 }
 0x136   :  { %3305 = vmatprep.mubr.msk.f32.mxu0 %vm65_vm0, %v3703_v59 }
 0x137   :  { %3206 = vmatmul.mubr.msk.f32.gmra.mrb[42].mxu1 %vm65_vm0, %v3712_v62  ;;  %v3097_v0 = vpop.f32.mrb[46].mxu0  ;;  %3431 = vmatprep.subr.bf16.mxu0 %v3430_v63 }
 0x138   :  { %3212 = vmatprep.mubr.msk.f32.mxu1 %vm65_vm0, %v3688_v51  ;;  %v506_v1 = vpop.f32.mrb[47].mxu0  ;;  %3433 = vmatpush3.bf16.msra.mxu0 %v3430_v63 }
 0x139   :  { %v3434_v2 = vpack.c.bf16 %v3097_v0, %v506_v1  ;;  %3306 = vmatmul.mubr.msk.f32.gmra.mrb[66].mxu0 %vm65_vm0, %v3712_v62 }
 0x13a   :  { %3322 = vmatprep.mubr.msk.f32.mxu0 %vm65_vm0, %v3688_v51 }
 0x13b   :  { %3213 = vmatmul.mubr.msk.f32.vlgmr.msra.gmra.mrb[44].mxu1 %vm65_vm0, %v3698_v57 }
 0x13c   :  { %3397 = vmatpush3.bf16.msra.mxu1 %v3764_v32  ;;  %3215 = vmatprep.mubr.msk.f32.mxu1 %vm65_vm0, %v3703_v59 }
 0x13d   :  { %3403 = vmatprep.subr.bf16.mxu1 %v3778_v38  ;;  %3323 = vmatmul.mubr.msk.f32.vlgmr.msra.gmra.mrb[68].mxu0 %vm65_vm0, %v3698_v57 }
 0x13e   :  { %3325 = vmatprep.mubr.msk.f32.mxu0 %vm65_vm0, %v3703_v59 }
 0x13f   :  { %3216 = vmatmul.mubr.msk.f32.gmra.mrb[46].mxu1 %vm65_vm0, %v3712_v62 }
 0x140   :  { %3232 = vmatprep.mubr.msk.f32.mxu1 %vm65_vm0, %v3688_v51 }
 0x141   :  { %3326 = vmatmul.mubr.msk.f32.gmra.mrb[70].mxu0 %vm65_vm0, %v3712_v62 }
 0x143   :  { %3233 = vmatmul.mubr.msk.f32.vlgmr.msra.gmra.mrb[48].mxu1 %vm65_vm0, %v3698_v57 }
 0x144   :  { %3405 = vmatpush3.bf16.msra.mxu1 %v3778_v38  ;;  %3235 = vmatprep.mubr.msk.f32.mxu1 %vm65_vm0, %v3703_v59 }
 0x145   :  { %3411 = vmatprep.subr.bf16.mxu1 %v3797_v44 }
 0x147   :  { %3236 = vmatmul.mubr.msk.f32.gmra.mrb[50].mxu1 %vm65_vm0, %v3712_v62 }
 0x148   :  { %3252 = vmatprep.mubr.msk.f32.mxu1 %vm65_vm0, %v3688_v51 }
 0x14b   :  { %3253 = vmatmul.mubr.msk.f32.vlgmr.msra.gmra.mrb[52].mxu1 %vm65_vm0, %v3698_v57 }
 0x14c   :  { %3413 = vmatpush3.bf16.msra.mxu1 %v3797_v44  ;;  %3255 = vmatprep.mubr.msk.f32.mxu1 %vm65_vm0, %v3703_v59 }
 0x14d   :  { %3419 = vmatprep.subr.bf16.mxu1 %v3418_v50 }
 0x14f   :  { %3256 = vmatmul.mubr.msk.f32.gmra.mrb[54].mxu1 %vm65_vm0, %v3712_v62 }
 0x150   :  { %3272 = vmatprep.mubr.msk.f32.mxu1 %vm65_vm0, %v3688_v51 }
 0x153   :  { %3273 = vmatmul.mubr.msk.f32.vlgmr.msra.gmra.mrb[56].mxu1 %vm65_vm0, %v3698_v57 }
 0x154   :  { %3421 = vmatpush3.bf16.msra.mxu1 %v3418_v50  ;;  %3275 = vmatprep.mubr.msk.f32.mxu1 %vm65_vm0, %v3703_v59 }
 0x155   :  { %3427 = vmatprep.subr.bf16.mxu1 %v3426_v58 }
 0x157   :  { %3276 = vmatmul.mubr.msk.f32.gmra.mrb[58].mxu1 %vm65_vm0, %v3712_v62 }
 0x158   :  { %3292 = vmatprep.mubr.msk.f32.mxu1 %vm65_vm0, %v3688_v51 }
 0x15b   :  { %3293 = vmatmul.mubr.msk.f32.vlgmr.msra.gmra.mrb[60].mxu1 %vm65_vm0, %v3698_v57 }
 0x15c   :  { %3429 = vmatpush3.bf16.msra.mxu1 %v3426_v58  ;;  %3295 = vmatprep.mubr.msk.f32.mxu1 %vm65_vm0, %v3703_v59 }
 0x15d   :  { %3435 = vmatprep.subr.bf16.mxu1 %v3434_v2 }
 0x15f   :  { %3296 = vmatmul.mubr.msk.f32.gmra.mrb[62].mxu1 %vm65_vm0, %v3712_v62 }
 0x160   :  { %3312 = vmatprep.mubr.msk.f32.mxu1 %vm65_vm0, %v3688_v51 }
 0x163   :  { %3313 = vmatmul.mubr.msk.f32.vlgmr.msra.gmra.mrb[64].mxu1 %vm65_vm0, %v3698_v57 }
 0x164   :  { %3437 = vmatpush3.bf16.msra.mxu1 %v3434_v2  ;;  %3315 = vmatprep.mubr.msk.f32.mxu1 %vm65_vm0, %v3703_v59 }
 0x167   :  { %3316 = vmatmul.mubr.msk.f32.gmra.mrb[66].mxu1 %vm65_vm0, %v3712_v62 }
 0x168   :  { %3332 = vmatprep.mubr.msk.f32.mxu1 %vm65_vm0, %v3688_v51 }
 0x16b   :  { %3333 = vmatmul.mubr.msk.f32.vlgmr.msra.gmra.mrb[68].mxu1 %vm65_vm0, %v3698_v57 }
 0x16c   :  { %3335 = vmatprep.mubr.msk.f32.mxu1 %vm65_vm0, %v3703_v59 }
 0x16f   :  { %3336 = vmatmul.mubr.msk.f32.gmra.mrb[70].mxu1 %vm65_vm0, %v3712_v62 }
 0x1b6   :  { %v3104_v3 = vpop.f32.mrb[0].mxu1 }
 0x1b7   :  { %2573 = vst.msk [vmem:[#allocation2 + $0x8] sm:$0xff] %vm2571_vm1, %v3104_v3  ;;  %v597_v4 = vpop.f32.mrb[1].mxu1 }
 0x1b8   :  { %2572 = vst.msk [vmem:[#allocation2] sm:$0xff] %vm2571_vm1, %v597_v4 }
 0x1ba   :  { %v3107_v5 = vpop.f32.mrb[2].mxu1 }
 0x1bb   :  { %2575 = vst.msk [vmem:[#allocation2 + $0x18] sm:$0xff] %vm2571_vm1, %v3107_v5  ;;  %v607_v51 = vpop.f32.mrb[3].mxu1 }
 0x1bc   :  { %2574 = vst.msk [vmem:[#allocation2 + $0x10] sm:$0xff] %vm2571_vm1, %v607_v51 }
 0x1be   :  { %v3114_v57 = vpop.f32.mrb[4].mxu1 }
 0x1bf   :  { %2577 = vst.msk [vmem:[#allocation2 + $0x28] sm:$0xff] %vm2571_vm1, %v3114_v57  ;;  %v682_v59 = vpop.f32.mrb[5].mxu1 }
 0x1c0   :  { %2576 = vst.msk [vmem:[#allocation2 + $0x20] sm:$0xff] %vm2571_vm1, %v682_v59 }
 0x1c2   :  { %v3117_v62 = vpop.f32.mrb[6].mxu1 }
 0x1c3   :  { %2579 = vst.msk [vmem:[#allocation2 + $0x38] sm:$0xff] %vm2571_vm1, %v3117_v62  ;;  %v692_v6 = vpop.f32.mrb[7].mxu1 }
 0x1c4   :  { %2578 = vst.msk [vmem:[#allocation2 + $0x30] sm:$0xff] %vm2571_vm1, %v692_v6 }
 0x1c6   :  { %v3124_v7 = vpop.f32.mrb[8].mxu1 }
 0x1c7   :  { %2581 = vst.msk [vmem:[#allocation2 + $0x48] sm:$0xff] %vm2571_vm1, %v3124_v7  ;;  %v767_v8 = vpop.f32.mrb[9].mxu1 }
 0x1c8   :  { %2580 = vst.msk [vmem:[#allocation2 + $0x40] sm:$0xff] %vm2571_vm1, %v767_v8 }
 0x1ca   :  { %v3127_v9 = vpop.f32.mrb[10].mxu1 }
 0x1cb   :  { %2583 = vst.msk [vmem:[#allocation2 + $0x58] sm:$0xff] %vm2571_vm1, %v3127_v9  ;;  %v777_v10 = vpop.f32.mrb[11].mxu1 }
 0x1cc   :  { %2582 = vst.msk [vmem:[#allocation2 + $0x50] sm:$0xff] %vm2571_vm1, %v777_v10 }
 0x1ce   :  { %v3134_v11 = vpop.f32.mrb[12].mxu1 }
 0x1cf   :  { %2585 = vst.msk [vmem:[#allocation2 + $0x68] sm:$0xff] %vm2571_vm1, %v3134_v11  ;;  %v852_v12 = vpop.f32.mrb[13].mxu1 }
 0x1d0   :  { %2584 = vst.msk [vmem:[#allocation2 + $0x60] sm:$0xff] %vm2571_vm1, %v852_v12 }
 0x1d2   :  { %v3137_v13 = vpop.f32.mrb[14].mxu1 }
 0x1d3   :  { %2587 = vst.msk [vmem:[#allocation2 + $0x78] sm:$0xff] %vm2571_vm1, %v3137_v13  ;;  %v862_v14 = vpop.f32.mrb[15].mxu1 }
 0x1d4   :  { %2586 = vst.msk [vmem:[#allocation2 + $0x70] sm:$0xff] %vm2571_vm1, %v862_v14 }
 0x1d6   :  { %v3144_v15 = vpop.f32.mrb[16].mxu1 }
 0x1d7   :  { %2589 = vst.msk [vmem:[#allocation2 + $0x88] sm:$0xff] %vm2571_vm1, %v3144_v15  ;;  %v937_v16 = vpop.f32.mrb[17].mxu1 }
 0x1d8   :  { %2588 = vst.msk [vmem:[#allocation2 + $0x80] sm:$0xff] %vm2571_vm1, %v937_v16 }
 0x1da   :  { %v3147_v17 = vpop.f32.mrb[18].mxu1 }
 0x1db   :  { %2591 = vst.msk [vmem:[#allocation2 + $0x98] sm:$0xff] %vm2571_vm1, %v3147_v17  ;;  %v947_v18 = vpop.f32.mrb[19].mxu1 }
 0x1dc   :  { %2590 = vst.msk [vmem:[#allocation2 + $0x90] sm:$0xff] %vm2571_vm1, %v947_v18 }
 0x1de   :  { %v3154_v19 = vpop.f32.mrb[20].mxu1 }
 0x1df   :  { %2593 = vst.msk [vmem:[#allocation2 + $0xa8] sm:$0xff] %vm2571_vm1, %v3154_v19  ;;  %v1022_v20 = vpop.f32.mrb[21].mxu1 }
 0x1e0   :  { %2592 = vst.msk [vmem:[#allocation2 + $0xa0] sm:$0xff] %vm2571_vm1, %v1022_v20 }
 0x1e2   :  { %v3157_v21 = vpop.f32.mrb[22].mxu1 }
 0x1e3   :  { %2595 = vst.msk [vmem:[#allocation2 + $0xb8] sm:$0xff] %vm2571_vm1, %v3157_v21  ;;  %v1032_v22 = vpop.f32.mrb[23].mxu1 }
 0x1e4   :  { %2594 = vst.msk [vmem:[#allocation2 + $0xb0] sm:$0xff] %vm2571_vm1, %v1032_v22 }
 0x1e6   :  { %v3164_v23 = vpop.f32.mrb[24].mxu1  ;;  %v3224_v24 = vpop.f32.mrb[48].mxu0 }
 0x1e7   :  { %2597 = vst.msk [vmem:[#allocation2 + $0xc8] sm:$0xff] %vm2571_vm1, %v3164_v23  ;;  %v1107_v25 = vpop.f32.mrb[25].mxu1  ;;  %2621 = vst.msk [vmem:[#allocation2 + $0x188] sm:$0xff] %vm2571_vm1, %v3224_v24  ;;  %v1617_v26 = vpop.f32.mrb[49].mxu0 }
 0x1e8   :  { %2596 = vst.msk [vmem:[#allocation2 + $0xc0] sm:$0xff] %vm2571_vm1, %v1107_v25  ;;  %2620 = vst.msk [vmem:[#allocation2 + $0x180] sm:$0xff] %vm2571_vm1, %v1617_v26 }
 0x1ea   :  { %v3167_v27 = vpop.f32.mrb[26].mxu1 }
 0x1eb   :  { %2599 = vst.msk [vmem:[#allocation2 + $0xd8] sm:$0xff] %vm2571_vm1, %v3167_v27  ;;  %v1117_v28 = vpop.f32.mrb[27].mxu1 }
 0x1ec   :  { %2598 = vst.msk [vmem:[#allocation2 + $0xd0] sm:$0xff] %vm2571_vm1, %v1117_v28  ;;  %v3227_v29 = vpop.f32.mrb[50].mxu0 }
 0x1ed   :  { %2623 = vst.msk [vmem:[#allocation2 + $0x198] sm:$0xff] %vm2571_vm1, %v3227_v29  ;;  %v1627_v30 = vpop.f32.mrb[51].mxu0 }
 0x1ee   :  { %v3174_v31 = vpop.f32.mrb[28].mxu1  ;;  %2622 = vst.msk [vmem:[#allocation2 + $0x190] sm:$0xff] %vm2571_vm1, %v1627_v30 }
 0x1ef   :  { %2601 = vst.msk [vmem:[#allocation2 + $0xe8] sm:$0xff] %vm2571_vm1, %v3174_v31  ;;  %v1192_v32 = vpop.f32.mrb[29].mxu1 }
 0x1f0   :  { %2600 = vst.msk [vmem:[#allocation2 + $0xe0] sm:$0xff] %vm2571_vm1, %v1192_v32  ;;  %v3244_v33 = vpop.f32.mrb[52].mxu0 }
 0x1f1   :  { %2629 = vst.msk [vmem:[#allocation2 + $0x1c8] sm:$0xff] %vm2571_vm1, %v3244_v33  ;;  %v1787_v34 = vpop.f32.mrb[53].mxu0 }
 0x1f2   :  { %v3177_v35 = vpop.f32.mrb[30].mxu1  ;;  %2628 = vst.msk [vmem:[#allocation2 + $0x1c0] sm:$0xff] %vm2571_vm1, %v1787_v34 }
 0x1f3   :  { %2603 = vst.msk [vmem:[#allocation2 + $0xf8] sm:$0xff] %vm2571_vm1, %v3177_v35  ;;  %v1202_v36 = vpop.f32.mrb[31].mxu1 }
 0x1f4   :  { %2602 = vst.msk [vmem:[#allocation2 + $0xf0] sm:$0xff] %vm2571_vm1, %v1202_v36  ;;  %v3247_v37 = vpop.f32.mrb[54].mxu0 }
 0x1f5   :  { %2631 = vst.msk [vmem:[#allocation2 + $0x1d8] sm:$0xff] %vm2571_vm1, %v3247_v37  ;;  %v1797_v38 = vpop.f32.mrb[55].mxu0 }
 0x1f6   :  { %v3184_v39 = vpop.f32.mrb[32].mxu1  ;;  %2630 = vst.msk [vmem:[#allocation2 + $0x1d0] sm:$0xff] %vm2571_vm1, %v1797_v38 }
 0x1f7   :  { %2605 = vst.msk [vmem:[#allocation2 + $0x108] sm:$0xff] %vm2571_vm1, %v3184_v39  ;;  %v1277_v40 = vpop.f32.mrb[33].mxu1 }
 0x1f8   :  { %2604 = vst.msk [vmem:[#allocation2 + $0x100] sm:$0xff] %vm2571_vm1, %v1277_v40  ;;  %v3264_v41 = vpop.f32.mrb[56].mxu0 }
 0x1f9   :  { %2637 = vst.msk [vmem:[#allocation2 + $0x208] sm:$0xff] %vm2571_vm1, %v3264_v41  ;;  %v1957_v42 = vpop.f32.mrb[57].mxu0 }
 0x1fa   :  { %v3187_v43 = vpop.f32.mrb[34].mxu1  ;;  %2636 = vst.msk [vmem:[#allocation2 + $0x200] sm:$0xff] %vm2571_vm1, %v1957_v42 }
 0x1fb   :  { %2607 = vst.msk [vmem:[#allocation2 + $0x118] sm:$0xff] %vm2571_vm1, %v3187_v43  ;;  %v1287_v44 = vpop.f32.mrb[35].mxu1 }
 0x1fc   :  { %2606 = vst.msk [vmem:[#allocation2 + $0x110] sm:$0xff] %vm2571_vm1, %v1287_v44  ;;  %v3267_v45 = vpop.f32.mrb[58].mxu0 }
 0x1fd   :  { %2639 = vst.msk [vmem:[#allocation2 + $0x218] sm:$0xff] %vm2571_vm1, %v3267_v45  ;;  %v1967_v46 = vpop.f32.mrb[59].mxu0 }
 0x1fe   :  { %v3194_v47 = vpop.f32.mrb[36].mxu1  ;;  %2638 = vst.msk [vmem:[#allocation2 + $0x210] sm:$0xff] %vm2571_vm1, %v1967_v46 }
 0x1ff   :  { %2609 = vst.msk [vmem:[#allocation2 + $0x128] sm:$0xff] %vm2571_vm1, %v3194_v47  ;;  %v1362_v48 = vpop.f32.mrb[37].mxu1 }
 0x200   :  { %2608 = vst.msk [vmem:[#allocation2 + $0x120] sm:$0xff] %vm2571_vm1, %v1362_v48  ;;  %v3284_v49 = vpop.f32.mrb[60].mxu0 }
 0x201   :  { %2645 = vst.msk [vmem:[#allocation2 + $0x248] sm:$0xff] %vm2571_vm1, %v3284_v49  ;;  %v2127_v50 = vpop.f32.mrb[61].mxu0 }
 0x202   :  { %v3197_v52 = vpop.f32.mrb[38].mxu1  ;;  %2644 = vst.msk [vmem:[#allocation2 + $0x240] sm:$0xff] %vm2571_vm1, %v2127_v50 }
 0x203   :  { %2611 = vst.msk [vmem:[#allocation2 + $0x138] sm:$0xff] %vm2571_vm1, %v3197_v52  ;;  %v1372_v53 = vpop.f32.mrb[39].mxu1 }
 0x204   :  { %2610 = vst.msk [vmem:[#allocation2 + $0x130] sm:$0xff] %vm2571_vm1, %v1372_v53  ;;  %v3287_v54 = vpop.f32.mrb[62].mxu0 }
 0x205   :  { %2647 = vst.msk [vmem:[#allocation2 + $0x258] sm:$0xff] %vm2571_vm1, %v3287_v54  ;;  %v2137_v55 = vpop.f32.mrb[63].mxu0 }
 0x206   :  { %v3204_v56 = vpop.f32.mrb[40].mxu1  ;;  %2646 = vst.msk [vmem:[#allocation2 + $0x250] sm:$0xff] %vm2571_vm1, %v2137_v55 }
 0x207   :  { %2613 = vst.msk [vmem:[#allocation2 + $0x148] sm:$0xff] %vm2571_vm1, %v3204_v56  ;;  %v1447_v58 = vpop.f32.mrb[41].mxu1 }
 0x208   :  { %2612 = vst.msk [vmem:[#allocation2 + $0x140] sm:$0xff] %vm2571_vm1, %v1447_v58  ;;  %v3304_v60 = vpop.f32.mrb[64].mxu0 }
 0x209   :  { %2653 = vst.msk [vmem:[#allocation2 + $0x288] sm:$0xff] %vm2571_vm1, %v3304_v60  ;;  %v2297_v61 = vpop.f32.mrb[65].mxu0 }
 0x20a   :  { %v3207_v63 = vpop.f32.mrb[42].mxu1  ;;  %2652 = vst.msk [vmem:[#allocation2 + $0x280] sm:$0xff] %vm2571_vm1, %v2297_v61 }
 0x20b   :  { %2615 = vst.msk [vmem:[#allocation2 + $0x158] sm:$0xff] %vm2571_vm1, %v3207_v63  ;;  %v1457_v0 = vpop.f32.mrb[43].mxu1 }
 0x20c   :  { %2614 = vst.msk [vmem:[#allocation2 + $0x150] sm:$0xff] %vm2571_vm1, %v1457_v0  ;;  %v3307_v1 = vpop.f32.mrb[66].mxu0 }
 0x20d   :  { %2655 = vst.msk [vmem:[#allocation2 + $0x298] sm:$0xff] %vm2571_vm1, %v3307_v1  ;;  %v2307_v2 = vpop.f32.mrb[67].mxu0 }
 0x20e   :  { %v3214_v3 = vpop.f32.mrb[44].mxu1  ;;  %2654 = vst.msk [vmem:[#allocation2 + $0x290] sm:$0xff] %vm2571_vm1, %v2307_v2 }
 0x20f   :  { %2617 = vst.msk [vmem:[#allocation2 + $0x168] sm:$0xff] %vm2571_vm1, %v3214_v3  ;;  %v1532_v4 = vpop.f32.mrb[45].mxu1 }
 0x210   :  { %2616 = vst.msk [vmem:[#allocation2 + $0x160] sm:$0xff] %vm2571_vm1, %v1532_v4  ;;  %v3324_v5 = vpop.f32.mrb[68].mxu0 }
 0x211   :  { %2661 = vst.msk [vmem:[#allocation2 + $0x2c8] sm:$0xff] %vm2571_vm1, %v3324_v5  ;;  %v2467_v51 = vpop.f32.mrb[69].mxu0 }
 0x212   :  { %v3217_v57 = vpop.f32.mrb[46].mxu1  ;;  %2660 = vst.msk [vmem:[#allocation2 + $0x2c0] sm:$0xff] %vm2571_vm1, %v2467_v51 }
 0x213   :  { %2619 = vst.msk [vmem:[#allocation2 + $0x178] sm:$0xff] %vm2571_vm1, %v3217_v57  ;;  %v1542_v59 = vpop.f32.mrb[47].mxu1 }
 0x214   :  { %2618 = vst.msk [vmem:[#allocation2 + $0x170] sm:$0xff] %vm2571_vm1, %v1542_v59  ;;  %v3327_v62 = vpop.f32.mrb[70].mxu0 }
 0x215   :  { %2663 = vst.msk [vmem:[#allocation2 + $0x2d8] sm:$0xff] %vm2571_vm1, %v3327_v62  ;;  %v2477_v6 = vpop.f32.mrb[71].mxu0 }
 0x216   :  { %v3234_v7 = vpop.f32.mrb[48].mxu1  ;;  %2662 = vst.msk [vmem:[#allocation2 + $0x2d0] sm:$0xff] %vm2571_vm1, %v2477_v6 }
 0x217   :  { %2625 = vst.msk [vmem:[#allocation2 + $0x1a8] sm:$0xff] %vm2571_vm1, %v3234_v7  ;;  %v1702_v8 = vpop.f32.mrb[49].mxu1 }
 0x218   :  { %2624 = vst.msk [vmem:[#allocation2 + $0x1a0] sm:$0xff] %vm2571_vm1, %v1702_v8 }
 0x21a   :  { %v3237_v9 = vpop.f32.mrb[50].mxu1 }
 0x21b   :  { %2627 = vst.msk [vmem:[#allocation2 + $0x1b8] sm:$0xff] %vm2571_vm1, %v3237_v9  ;;  %v1712_v10 = vpop.f32.mrb[51].mxu1 }
 0x21c   :  { %2626 = vst.msk [vmem:[#allocation2 + $0x1b0] sm:$0xff] %vm2571_vm1, %v1712_v10 }
 0x21e   :  { %v3254_v11 = vpop.f32.mrb[52].mxu1 }
 0x21f   :  { %2633 = vst.msk [vmem:[#allocation2 + $0x1e8] sm:$0xff] %vm2571_vm1, %v3254_v11  ;;  %v1872_v12 = vpop.f32.mrb[53].mxu1 }
 0x220   :  { %2632 = vst.msk [vmem:[#allocation2 + $0x1e0] sm:$0xff] %vm2571_vm1, %v1872_v12 }
 0x222   :  { %v3257_v13 = vpop.f32.mrb[54].mxu1 }
 0x223   :  { %2635 = vst.msk [vmem:[#allocation2 + $0x1f8] sm:$0xff] %vm2571_vm1, %v3257_v13  ;;  %v1882_v14 = vpop.f32.mrb[55].mxu1 }
 0x224   :  { %2634 = vst.msk [vmem:[#allocation2 + $0x1f0] sm:$0xff] %vm2571_vm1, %v1882_v14 }
 0x226   :  { %v3274_v15 = vpop.f32.mrb[56].mxu1 }
 0x227   :  { %2641 = vst.msk [vmem:[#allocation2 + $0x228] sm:$0xff] %vm2571_vm1, %v3274_v15  ;;  %v2042_v16 = vpop.f32.mrb[57].mxu1 }
 0x228   :  { %2640 = vst.msk [vmem:[#allocation2 + $0x220] sm:$0xff] %vm2571_vm1, %v2042_v16 }
 0x22a   :  { %v3277_v17 = vpop.f32.mrb[58].mxu1 }
 0x22b   :  { %2643 = vst.msk [vmem:[#allocation2 + $0x238] sm:$0xff] %vm2571_vm1, %v3277_v17  ;;  %v2052_v18 = vpop.f32.mrb[59].mxu1 }
 0x22c   :  { %2642 = vst.msk [vmem:[#allocation2 + $0x230] sm:$0xff] %vm2571_vm1, %v2052_v18 }
 0x22e   :  { %v3294_v19 = vpop.f32.mrb[60].mxu1 }
 0x22f   :  { %2649 = vst.msk [vmem:[#allocation2 + $0x268] sm:$0xff] %vm2571_vm1, %v3294_v19  ;;  %v2212_v20 = vpop.f32.mrb[61].mxu1 }
 0x230   :  { %2648 = vst.msk [vmem:[#allocation2 + $0x260] sm:$0xff] %vm2571_vm1, %v2212_v20 }
 0x232   :  { %v3297_v21 = vpop.f32.mrb[62].mxu1 }
 0x233   :  { %2651 = vst.msk [vmem:[#allocation2 + $0x278] sm:$0xff] %vm2571_vm1, %v3297_v21  ;;  %v2222_v22 = vpop.f32.mrb[63].mxu1 }
 0x234   :  { %2650 = vst.msk [vmem:[#allocation2 + $0x270] sm:$0xff] %vm2571_vm1, %v2222_v22 }
 0x236   :  { %v3314_v23 = vpop.f32.mrb[64].mxu1 }
 0x237   :  { %2657 = vst.msk [vmem:[#allocation2 + $0x2a8] sm:$0xff] %vm2571_vm1, %v3314_v23  ;;  %v2382_v24 = vpop.f32.mrb[65].mxu1 }
 0x238   :  { %2656 = vst.msk [vmem:[#allocation2 + $0x2a0] sm:$0xff] %vm2571_vm1, %v2382_v24 }
 0x23a   :  { %v3317_v25 = vpop.f32.mrb[66].mxu1 }
 0x23b   :  { %2659 = vst.msk [vmem:[#allocation2 + $0x2b8] sm:$0xff] %vm2571_vm1, %v3317_v25  ;;  %v2392_v26 = vpop.f32.mrb[67].mxu1 }
 0x23c   :  { %2658 = vst.msk [vmem:[#allocation2 + $0x2b0] sm:$0xff] %vm2571_vm1, %v2392_v26 }
 0x23e   :  { %v3334_v27 = vpop.f32.mrb[68].mxu1 }
 0x23f   :  { %2665 = vst.msk [vmem:[#allocation2 + $0x2e8] sm:$0xff] %vm2571_vm1, %v3334_v27  ;;  %v2552_v28 = vpop.f32.mrb[69].mxu1 }
 0x240   :  { %2664 = vst.msk [vmem:[#allocation2 + $0x2e0] sm:$0xff] %vm2571_vm1, %v2552_v28 }
 0x242   :  { %v3337_v29 = vpop.f32.mrb[70].mxu1 }
 0x243   :  { %2667 = vst.msk [vmem:[#allocation2 + $0x2f8] sm:$0xff] %vm2571_vm1, %v3337_v29  ;;  %v2562_v30 = vpop.f32.mrb[71].mxu1 }
 0x244   :  { %2666 = vst.msk [vmem:[#allocation2 + $0x2f0] sm:$0xff] %vm2571_vm1, %v2562_v30 }
 0x245   :  { %3452 = shalt.err (!%p3449_p4)
}
 0x246   :  { %s3453_s11 = scalar_lea.hbm %s4033_s3, 12288 }
 0x247   :  { %p3454_p5 = scmp.ne.s32.totalorder %s4033_s3, %s3453_s11  ;;  %p3457_p6 = scmp.lt.u32.totalorder %s3453_s11, %s4033_s3 }
 0x249   :  { %p3459_p7 = pnand %p3457_p6, %p3454_p5 }
 0x24b   :  { %3462 = shalt.err (!%p3459_p7)
}
 0x24c   :  { %s3466_s16 = smov 128   ;;  %s3467_s17 = smov 8  }
 0x24d   :  { %2679 = dma.vmem_to_hbm [thread:$0]  %s2674_s7, 12288, %s4033_s3, [#allocation3], %s3466_s16, %s3466_s16, %s3467_s17  }
 0x24e   :  { %3463 = dma.done.wait [#allocation3], 12288  }
 0x24f   :  { %3464 = vsyncadd [#allocation3], 4294955008 }
 0x250   :  { %2683 = vsyncpa [#allocation3], 1 }

</bundles_post_ra>
